<compile_context>
chip_gen: v7x
topology: tpu7x:2x2x1
jax: 0.10.0
libtpu: 0.0.40
codegen_flags: <defaults>
</compile_context>

<pallas_src>
import jax
import jax.numpy as jnp
from jax.experimental import pallas as pl
from jax.experimental.pallas import tpu as pltpu


# ---------------------------------------------------------------------------
# Kernels
# ---------------------------------------------------------------------------
def _log_prob_kernel(actions_ref, logits_ref, out_ref):
    """Categorical.log_prob for one [TB, N] tile.

    out[b] = logits[b, act[b]] - logsumexp(logits[b, :])
    """
    logits = logits_ref[...].astype(jnp.float32)                 # [TB, N]
    tb, n = logits.shape

    # numerically-stable logsumexp over the lane axis (XLU reductions)
    m = jnp.max(logits, axis=-1, keepdims=True)                  # [TB, 1]
    lse = m + jnp.log(jnp.sum(jnp.exp(logits - m), axis=-1, keepdims=True))

    # gather logits[b, act[b]] via a masked lane-sum (no full logp matrix)
    col = jax.lax.broadcasted_iota(jnp.int32, (tb, n), 1)        # [TB, N]
    act = actions_ref[...]                                       # [TB, 1] int32
    selected = jnp.sum(jnp.where(col == act, logits, 0.0),
                       axis=-1, keepdims=True)                   # [TB, 1]

    out_ref[...] = selected - lse                                # [TB, 1]


def _sample_kernel(logits_ref, u_ref, out_ref):
    """Gumbel-max categorical sample for one [TB, N] tile.

    u_ref holds uniform(0,1) randoms generated on the host side with
    jax.random (the hardware PRNG primitives have no interpret-mode lowering).
    """
    logits = logits_ref[...].astype(jnp.float32)                 # [TB, N]
    tb, n = logits.shape

    # Clip so the bf16 path stays finite: 1 - 2^-8 is exactly representable in
    # bf16 (never rounds up to 1.0), 2^-24 keeps -log(u) <= ~17.
    u = jnp.clip(u_ref[...], 2.0 ** -24, 1.0 - 2.0 ** -8)
    # bf16 transcendentals: EUP bf16 on v6e/v7x (~2x throughput); on v5e this
    # is upcast by the compiler.  Sampling is insensitive to noise precision.
    g = (-jnp.log(-jnp.log(u.astype(jnp.bfloat16)))).astype(jnp.float32)

    z = logits + g                                               # [TB, N]

    # argmax over lanes, expressed with max / compare / min (robust lowering,
    # first-max tie-breaking identical to argmax).
    m = jnp.max(z, axis=-1, keepdims=True)                       # [TB, 1]
    col = jax.lax.broadcasted_iota(jnp.int32, (tb, n), 1)        # [TB, N]
    idx = jnp.min(jnp.where(z >= m, col, n), axis=-1, keepdims=True)
    out_ref[...] = idx.astype(jnp.int32)                         # [TB, 1]


# ---------------------------------------------------------------------------
# Tiling helper
# ---------------------------------------------------------------------------
def _batch_tile(B, N, n_streams, elem_bytes=4, vmem_budget=8 * 1024 * 1024):
    """Rows per grid step: biggest tile that (double-buffered) stays well under
    the scoped-VMEM limit on all generations (incl. v7x's smaller VMEM)."""
    rows = vmem_budget // max(1, 2 * n_streams * N * elem_bytes)
    rows = int(max(8, min(rows, 1024)))
    if B <= rows:
        return B                     # full batch in one block (always legal)
    return max(8, (rows // 8) * 8)   # sublane-aligned tile


# ---------------------------------------------------------------------------
# Wrappers
# ---------------------------------------------------------------------------
def categorical_log_prob(logits, actions):
    """logits: [B, N] float, actions: [B] int -> log_prob: [B] float32."""
    B, N = logits.shape
    actions2d = actions.astype(jnp.int32).reshape(B, 1)
    tb = _batch_tile(B, N, n_streams=1, elem_bytes=logits.dtype.itemsize)
    grid = (pl.cdiv(B, tb),)

    out = pl.pallas_call(
        _log_prob_kernel,
        out_shape=jax.ShapeDtypeStruct((B, 1), jnp.float32),
        grid=grid,
        in_specs=[
            pl.BlockSpec((tb, 1), lambda i: (i, 0)),   # actions
            pl.BlockSpec((tb, N), lambda i: (i, 0)),   # logits
        ],
        out_specs=pl.BlockSpec((tb, 1), lambda i: (i, 0)),
        compiler_params=pltpu.CompilerParams(
            dimension_semantics=("parallel",)),
        cost_estimate=pl.CostEstimate(
            flops=int(6 * B * N),
            transcendentals=int(B * N + B),
            bytes_accessed=int(B * N * logits.dtype.itemsize + 8 * B),
        ),
    )(actions2d, logits)
    return out.reshape(B)


def categorical_sample(logits, key):
    """logits: [B, N] float, key: jax PRNG key -> samples: [B] int32."""
    B, N = logits.shape
    # TODO(synk): on real TPU hardware the uniforms could be generated
    # in-kernel with pltpu.prng_seed/prng_random_bits (halves HBM traffic),
    # but those primitives have no interpret-mode lowering, so we stream
    # host-generated uniforms instead.
    u = jax.random.uniform(key, (B, N), dtype=jnp.float32)

    tb = _batch_tile(B, N, n_streams=2, elem_bytes=4)
    grid = (pl.cdiv(B, tb),)

    out = pl.pallas_call(
        _sample_kernel,
        out_shape=jax.ShapeDtypeStruct((B, 1), jnp.int32),
        grid=grid,
        in_specs=[
            pl.BlockSpec((tb, N), lambda i: (i, 0)),   # logits
            pl.BlockSpec((tb, N), lambda i: (i, 0)),   # uniforms
        ],
        out_specs=pl.BlockSpec((tb, 1), lambda i: (i, 0)),
        compiler_params=pltpu.CompilerParams(
            dimension_semantics=("parallel",)),
        cost_estimate=pl.CostEstimate(
            flops=int(6 * B * N),
            transcendentals=int(2 * B * N),
            bytes_accessed=int(B * N * (logits.dtype.itemsize + 4) + 4 * B),
        ),
    )(logits, u)
    return out.reshape(B)


class BaseDiscreteModel:
    """JAX/Pallas mirror of the PyTorch BaseDiscreteModel (no parameters)."""

    def forward(self, inputs):
        # TODO(synk): the PyTorch base forward raises AssertionError ("Base
        # forward model is not functional"); subclasses supply logits.  Here
        # inputs pass through as logits so the categorical kernels can run.
        return inputs

    def sample(self, observation, key=None):
        if key is None:
            key = jax.random.PRNGKey(0)
        logits = self.forward(self.flatten_observation(observation))
        return categorical_sample(logits, key)

    def log_prob(self, observations, actions):
        logits = self.forward(self.flatten_observation(observations))
        return categorical_log_prob(logits, self.flatten_action(actions))

    # flatten/unflatten are identity in the base class
    def flatten_observation(self, observation):
        return observation

    def flatten_action(self, action):
        return action

    def unflatten_observation(self, observation):
        return observation

    def unflatten_action(self, action):
        return action


# ---------------------------------------------------------------------------
# Demo / correctness check
# ---------------------------------------------------------------------------
if __name__ == "__main__":
    key = jax.random.PRNGKey(0)
    k_logits, k_actions, k_sample = jax.random.split(key, 3)

    B, N = 8, 128                      # batch x num_classes (N = lane axis)
    logits = jax.random.normal(k_logits, (B, N), dtype=jnp.float32)
    actions = jax.random.randint(k_actions, (B,), 0, N, dtype=jnp.int32)

    model = BaseDiscreteModel()

    lp = model.log_prob(logits, actions)
    samples = model.sample(logits, key=k_sample)

    # sampling sanity check: sharply peaked logits must return the peak class
    peak = jnp.arange(B, dtype=jnp.int32) % N
    peaked_logits = 50.0 * jax.nn.one_hot(peak, N, dtype=jnp.float32)
    peaked_samples = model.sample(peaked_logits, key=k_sample)

    jax.block_until_ready((lp, samples, peaked_samples))

    # reference check against plain-JAX log_softmax gather
    ref_lp = jax.nn.log_softmax(logits, axis=-1)[jnp.arange(B), actions]
    assert jnp.allclose(lp, ref_lp, atol=1e-5), (lp, ref_lp)
    assert samples.shape == (B,) and bool(jnp.all((samples >= 0) & (samples < N)))
    assert bool(jnp.all(peaked_samples == peak)), (peaked_samples, peak)

    print("KERNEL_OK")
</pallas_src>

<mosaic_0001>
module attributes {stable_mosaic.version = 11 : i64} {
  func.func @_log_prob_kernel(%arg0: i32, %arg1: memref<8x1xi32, #tpu.memory_space<vmem>>, %arg2: memref<8x128xf32, #tpu.memory_space<vmem>>, %arg3: memref<8x1xf32, #tpu.memory_space<vmem>>) attributes {dimension_semantics = [#tpu.dimension_semantics<parallel>], iteration_bounds = array<i64: 1>, scalar_prefetch = 0 : i64, scratch_operands = 0 : i64, tpu.core_type = #tpu.core_type<tc>, window_params = [{transform_indices = @transform_0, window_bounds = array<i64: 8, 1>}, {transform_indices = @transform_1, window_bounds = array<i64: 8, 128>}, {transform_indices = @transform_2, window_bounds = array<i64: 8, 1>}]} {
    %c0 = arith.constant 0 : index
    %c0_0 = arith.constant 0 : index
    %0 = vector.load %arg2[%c0, %c0_0] : memref<8x128xf32, #tpu.memory_space<vmem>>, vector<8x128xf32>
    %cst = arith.constant dense<0xFF800000> : vector<8xf32>
    %1 = vector.multi_reduction <maximumf>, %0, %cst [1] : vector<8x128xf32> to vector<8xf32>
    %2 = vector.shape_cast %1 : vector<8xf32> to vector<8x1xf32>
    %3 = vector.broadcast %2 : vector<8x1xf32> to vector<8x128xf32>
    %4 = arith.subf %0, %3 : vector<8x128xf32>
    %5 = math.exp %4 : vector<8x128xf32>
    %cst_1 = arith.constant dense<0.000000e+00> : vector<8xf32>
    %6 = vector.multi_reduction <add>, %5, %cst_1 [1] : vector<8x128xf32> to vector<8xf32>
    %7 = vector.shape_cast %6 : vector<8xf32> to vector<8x1xf32>
    %8 = math.log %7 : vector<8x1xf32>
    %9 = arith.addf %2, %8 : vector<8x1xf32>
    %10 = tpu.iota {dimensions = array<i32: 1>} : vector<8x128xi32>
    %c0_2 = arith.constant 0 : index
    %c0_3 = arith.constant 0 : index
    %11 = vector.load %arg1[%c0_2, %c0_3] : memref<8x1xi32, #tpu.memory_space<vmem>>, vector<8x1xi32>
    %12 = vector.broadcast %11 : vector<8x1xi32> to vector<8x128xi32>
    %13 = arith.cmpi eq, %10, %12 : vector<8x128xi32>
    %cst_4 = arith.constant 0.000000e+00 : f32
    %14 = vector.broadcast %cst_4 : f32 to vector<8x128xf32>
    %15 = arith.select %13, %0, %14 : vector<8x128xi1>, vector<8x128xf32>
    %cst_5 = arith.constant dense<0.000000e+00> : vector<8xf32>
    %16 = vector.multi_reduction <add>, %15, %cst_5 [1] : vector<8x128xf32> to vector<8xf32>
    %17 = vector.shape_cast %16 : vector<8xf32> to vector<8x1xf32>
    %18 = arith.subf %17, %9 : vector<8x1xf32>
    %c0_6 = arith.constant 0 : index
    %c0_7 = arith.constant 0 : index
    %19 = vector.load %arg3[%c0_6, %c0_7] : memref<8x1xf32, #tpu.memory_space<vmem>>, vector<8x1xf32>
    tpu.vector_store %arg3[%c0_6, %c0_7], %18 {strides = array<i32>} : memref<8x1xf32, #tpu.memory_space<vmem>>, vector<8x1xf32>,
    return
  }
  func.func @transform_0(%arg0: i32) -> (i32, i32) {
    %c0_i32 = arith.constant 0 : i32
    %c0_i32_0 = arith.constant 0 : i32
    return %arg0, %c0_i32 : i32, i32
  }
  func.func @transform_1(%arg0: i32) -> (i32, i32) {
    %c0_i32 = arith.constant 0 : i32
    %c0_i32_0 = arith.constant 0 : i32
    return %arg0, %c0_i32 : i32, i32
  }
  func.func @transform_2(%arg0: i32) -> (i32, i32) {
    %c0_i32 = arith.constant 0 : i32
    %c0_i32_0 = arith.constant 0 : i32
    return %arg0, %c0_i32 : i32, i32
  }
}

</mosaic_0001>

<bundles_post_ra>
// kernel: tpu_custom_call.1
= control target key start
LH: loop header
LB: loop body
LE: loop exit
PB: predicated region body
PF: predicated region fallthrough
CT: control target
= control target key end

     0   :  { %v45_v1 = vmov 0   ;;  %v22_v6 = vlaneseq  ;;  %vm33_vm1 = vcmask 7168   ;;  %s70_s1 = inlined_call_operand.vmem [shape: f32[8,128], index: 1, kind: input, shape index: {}]   ;;  %s71_s0 = inlined_call_operand.vmem [shape: s32[8,1], index: 0, kind: input, shape index: {}]   ;;  %s72_s2 = inlined_call_operand.vmem [shape: f32[8,1], index: 2, kind: output, shape index: {}]  }
   0x1   :  { %v11_v0 = vld [vmem:[%s70_s1] sm:$0xff]  ;;  %40 = vset.pattern.permute.xlu0 %v45_v1 }
   0x2   :  { %12 = vmax.xlane.f32.xlu0 %v11_v0  ;;  %v24_v2 = vld [vmem:[%s71_s0] sm:$0xff]  ;;  %v23_v7 = vand.u32 127, %v22_v6 }
  0x18   :  { %26 = vperm.xlu0 %40, %v24_v2  }
  0x8f   :  { %v13_v3 = vpop.xlane.xlu0 %12 }
  0x90   :  { %v14_v4 = vsub.f32 %v11_v0, %v13_v3 }
  0x92   :  { %v15_v5 = vmul.f32 1.442695, %v14_v4 }
  0x94   :  { %41 = vpow2.f32 %v15_v5 }
  0x97   :  { %v27_v8 = vpop.permute.xlu0 %26 }
  0x98   :  { %vm28_vm0 = vcmp.eq.s32.totalorder %v23_v7, %v27_v8 }
  0x99   :  { %v29_v10 = vsel %vm28_vm0, %v11_v0, 0.0 }
  0x9e   :  { %v42_v9 = vpop.eup %41 }
  0x9f   :  { %17 = vadd.xlane.f32.xlu1 %v42_v9 }
  0xa3   :  { %30 = vadd.xlane.f32.xlu1 %v29_v10 }
 0x12c   :  { %v18_v11 = vpop.xlane.xlu1 %17 }
 0x12d   :  { %43 = vlog2.f32 %v18_v11 }
 0x130   :  { %v31_v14 = vpop.xlane.xlu1 %30 }
 0x137   :  { %v44_v12 = vpop.eup %43 }
 0x138   :  { %v20_v13 = vmul.f32 0.6931472, %v44_v12 }
 0x13a   :  { %v21_v15 = vadd.f32 %v20_v13, %v13_v3 }
 0x13c   :  { %v32_v16 = vsub.f32 %v31_v14, %v21_v15 }
 0x13e   :  { %34 = vst.msk [vmem:[%s72_s2] sm:$0xff] %vm33_vm1, %v32_v16 }

</bundles_post_ra>
